<compile_context>
chip_gen: v7x
topology: tpu7x:2x2x1
jax: 0.10.0
libtpu: 0.0.40
codegen_flags: <defaults>
</compile_context>

<pallas_src>
import functools

import jax
import jax.numpy as jnp
from jax import lax
from jax.experimental import pallas as pl
from jax.experimental.pallas import tpu as pltpu


def _mha_kernel(q_ref, k_ref, v_ref,
                wq_ref, bq_ref, wk_ref, bk_ref, wv_ref, bv_ref,
                wo_ref, bo_ref,
                o_ref,
                *, num_heads: int, head_dim: int, use_bf16_matmul: bool):
    b_tile, seq, emb = q_ref.shape
    m_rows = b_tile * seq
    mm_dtype = jnp.bfloat16 if use_bf16_matmul else jnp.float32

    def mm(a, b):
        return jnp.dot(a.astype(mm_dtype), b.astype(mm_dtype),
                       preferred_element_type=jnp.float32)

    def bmm(eq, a, b):
        return jnp.einsum(eq, a.astype(mm_dtype), b.astype(mm_dtype),
                          preferred_element_type=jnp.float32)

    # ---- Q/K/V projections over the flattened (B_TILE*S, E) slab -----------
    xq = q_ref[...].reshape(m_rows, emb)
    xk = k_ref[...].reshape(m_rows, emb)
    xv = v_ref[...].reshape(m_rows, emb)

    # scaling is already folded into wq/bq by the wrapper.
    q = mm(xq, wq_ref[...]) + bq_ref[...]
    k = mm(xk, wk_ref[...]) + bk_ref[...]
    v = mm(xv, wv_ref[...]) + bv_ref[...]

    q3 = q.reshape(b_tile, seq, emb)
    k3 = k.reshape(b_tile, seq, emb)
    v3 = v.reshape(b_tile, seq, emb)

    # ---- Per-head attention with lane-dense (full-E) contractions ----------
    # Head h only uses lanes [h*hd, (h+1)*hd); masking Q and V to zero outside
    # those lanes makes the full-E contraction equal to the per-head one, and
    # summing per-head PV outputs replaces the lane-dim concatenation.
    lane = lax.broadcasted_iota(jnp.int32, (1, 1, emb), 2)
    acc = jnp.zeros((b_tile, seq, emb), jnp.float32)
    for h in range(num_heads):                      # static unroll over heads
        lo = h * head_dim
        mask = ((lane >= lo) & (lane < lo + head_dim)).astype(jnp.float32)
        qh = q3 * mask                              # (B_TILE, S, E)
        vh = v3 * mask

        scores = bmm('bqe,bke->bqk', qh, k3)        # (B_TILE, S, S), f32 acc
        mrow = jnp.max(scores, axis=-1, keepdims=True)
        e = jnp.exp(scores - mrow)                  # f32 softmax math
        denom = jnp.sum(e, axis=-1, keepdims=True)
        # EUP approx reciprocal + one Newton step => ~f32-exact, off the VPU.
        r = pl.reciprocal(denom, approx=True)
        r = r * (2.0 - denom * r)
        p = e * r
        acc = acc + bmm('bqk,bke->bqe', p, vh)      # accumulate head output

    # ---- Output projection --------------------------------------------------
    out = mm(acc.reshape(m_rows, emb), wo_ref[...]) + bo_ref[...]
    # TODO(synk): for real configs with E < 128, present a lane-dense output
    # slab (>=128 lanes) to avoid masked vst.msk partial stores.
    o_ref[...] = out.reshape(b_tile, seq, emb).astype(o_ref.dtype)


def multi_head_attention(query, key, value, params, *, num_heads,
                         use_bf16_matmul=False, b_tile=None):
    """query/key/value: (B, S, E) float32. params: dict of weights/biases."""
    B, S, E = query.shape
    head_dim = E // num_heads
    assert head_dim * num_heads == E
    scaling = float(head_dim) ** -0.5

    # Pick how many batch elements share one grid step so the flattened
    # projection matmuls have M = b_tile*S rows (target >= 128; must divide B).
    if b_tile is None:
        b_tile = max(1, min(B, pl.cdiv(128, S)))
        while B % b_tile:
            b_tile -= 1
    num_tiles = B // b_tile

    w_dtype = jnp.bfloat16 if use_bf16_matmul else query.dtype
    # Pre-transpose weights to (in, out); fold the softmax scaling into Wq/bq.
    wq_t = (params["wq"] * scaling).T.astype(w_dtype)
    wk_t = params["wk"].T.astype(w_dtype)
    wv_t = params["wv"].T.astype(w_dtype)
    wo_t = params["wo"].T.astype(w_dtype)
    bq = (params["bq"] * scaling).reshape(1, E).astype(jnp.float32)
    bk = params["bk"].reshape(1, E).astype(jnp.float32)
    bv = params["bv"].reshape(1, E).astype(jnp.float32)
    bo = params["bo"].reshape(1, E).astype(jnp.float32)

    kernel = functools.partial(
        _mha_kernel, num_heads=num_heads, head_dim=head_dim,
        use_bf16_matmul=use_bf16_matmul)

    seq_spec = pl.BlockSpec((b_tile, S, E), lambda t: (t, 0, 0))
    w_spec = pl.BlockSpec((E, E), lambda t: (0, 0))
    b_spec = pl.BlockSpec((1, E), lambda t: (0, 0))

    return pl.pallas_call(
        kernel,
        out_shape=jax.ShapeDtypeStruct((B, S, E), query.dtype),
        grid_spec=pltpu.PrefetchScalarGridSpec(
            num_scalar_prefetch=0,
            grid=(num_tiles,),
            in_specs=[seq_spec, seq_spec, seq_spec,
                      w_spec, b_spec, w_spec, b_spec, w_spec, b_spec,
                      w_spec, b_spec],
            out_specs=seq_spec,
        ),
        compiler_params=pltpu.CompilerParams(
            dimension_semantics=("parallel",)),
    )(query, key, value, wq_t, bq, wk_t, bk, wv_t, bv, wo_t, bo)


def _reference_mha(query, key, value, params, *, num_heads):
    """Pure-JAX reference mirroring the PyTorch forward pass."""
    B, S, E = query.shape
    hd = E // num_heads
    scaling = float(hd) ** -0.5

    def linear(x, w, b):
        return x @ w.T + b

    q = linear(query, params["wq"], params["bq"]).reshape(B, S, num_heads, hd).transpose(0, 2, 1, 3)
    k = linear(key, params["wk"], params["bk"]).reshape(B, S, num_heads, hd).transpose(0, 2, 1, 3)
    v = linear(value, params["wv"], params["bv"]).reshape(B, S, num_heads, hd).transpose(0, 2, 1, 3)
    scores = jnp.einsum("bhqd,bhkd->bhqk", q, k) * scaling
    attn = jax.nn.softmax(scores, axis=-1)
    out = jnp.einsum("bhqk,bhkd->bhqd", attn, v)
    out = out.transpose(0, 2, 1, 3).reshape(B, S, E)
    return linear(out, params["wo"], params["bo"])


if __name__ == "__main__":
    B, S, E, H = 2, 8, 32, 4

    key0 = jax.random.PRNGKey(0)
    ks = jax.random.split(key0, 11)
    scale = 1.0 / jnp.sqrt(E)
    params = {
        "wq": jax.random.normal(ks[0], (E, E), jnp.float32) * scale,
        "bq": jax.random.normal(ks[1], (E,), jnp.float32) * 0.1,
        "wk": jax.random.normal(ks[2], (E, E), jnp.float32) * scale,
        "bk": jax.random.normal(ks[3], (E,), jnp.float32) * 0.1,
        "wv": jax.random.normal(ks[4], (E, E), jnp.float32) * scale,
        "bv": jax.random.normal(ks[5], (E,), jnp.float32) * 0.1,
        "wo": jax.random.normal(ks[6], (E, E), jnp.float32) * scale,
        "bo": jax.random.normal(ks[7], (E,), jnp.float32) * 0.1,
    }

    query = jax.random.normal(ks[8], (B, S, E), jnp.float32)
    key_t = jax.random.normal(ks[9], (B, S, E), jnp.float32)
    value = jax.random.normal(ks[10], (B, S, E), jnp.float32)

    ref = _reference_mha(query, key_t, value, params, num_heads=H)

    # f32 matmul operands (default; v5e-friendly). Tolerance covers the
    # Newton-refined EUP reciprocal and MXU accumulation-order differences.
    out = multi_head_attention(query, key_t, value, params, num_heads=H)
    out = jax.block_until_ready(out)
    assert out.shape == (B, S, E)
    assert jnp.allclose(out, ref, atol=2e-3, rtol=2e-3), "f32 kernel mismatch vs reference"

    # bf16 matmul operands with f32 accumulation (v6e/v7x production setting);
    # softmax stays f32, so only operand quantization loosens the match.
    out_bf16 = multi_head_attention(query, key_t, value, params, num_heads=H,
                                    use_bf16_matmul=True)
    out_bf16 = jax.block_until_ready(out_bf16)
    assert jnp.allclose(out_bf16, ref, atol=1e-1, rtol=5e-2), "bf16 kernel mismatch vs reference"

    print("KERNEL_OK")
</pallas_src>

<mosaic_0001>
module attributes {stable_mosaic.version = 11 : i64} {
  func.func @_mha_kernel(%arg0: i32, %arg1: memref<2x8x32xf32, #tpu.memory_space<vmem>>, %arg2: memref<2x8x32xf32, #tpu.memory_space<vmem>>, %arg3: memref<2x8x32xf32, #tpu.memory_space<vmem>>, %arg4: memref<32x32xf32, #tpu.memory_space<vmem>>, %arg5: memref<1x32xf32, #tpu.memory_space<vmem>>, %arg6: memref<32x32xf32, #tpu.memory_space<vmem>>, %arg7: memref<1x32xf32, #tpu.memory_space<vmem>>, %arg8: memref<32x32xf32, #tpu.memory_space<vmem>>, %arg9: memref<1x32xf32, #tpu.memory_space<vmem>>, %arg10: memref<32x32xf32, #tpu.memory_space<vmem>>, %arg11: memref<1x32xf32, #tpu.memory_space<vmem>>, %arg12: memref<2x8x32xf32, #tpu.memory_space<vmem>>) attributes {dimension_semantics = [#tpu.dimension_semantics<parallel>], iteration_bounds = array<i64: 1>, scalar_prefetch = 0 : i64, scratch_operands = 0 : i64, tpu.core_type = #tpu.core_type<tc>, window_params = [{transform_indices = @transform_0, window_bounds = array<i64: 2, 8, 32>}, {transform_indices = @transform_1, window_bounds = array<i64: 2, 8, 32>}, {transform_indices = @transform_2, window_bounds = array<i64: 2, 8, 32>}, {pipeline_mode = #tpu.pipeline_mode<synchronous>, transform_indices = @transform_3, window_bounds = array<i64: 32, 32>}, {pipeline_mode = #tpu.pipeline_mode<synchronous>, transform_indices = @transform_4, window_bounds = array<i64: 1, 32>}, {pipeline_mode = #tpu.pipeline_mode<synchronous>, transform_indices = @transform_5, window_bounds = array<i64: 32, 32>}, {pipeline_mode = #tpu.pipeline_mode<synchronous>, transform_indices = @transform_6, window_bounds = array<i64: 1, 32>}, {pipeline_mode = #tpu.pipeline_mode<synchronous>, transform_indices = @transform_7, window_bounds = array<i64: 32, 32>}, {pipeline_mode = #tpu.pipeline_mode<synchronous>, transform_indices = @transform_8, window_bounds = array<i64: 1, 32>}, {pipeline_mode = #tpu.pipeline_mode<synchronous>, transform_indices = @transform_9, window_bounds = array<i64: 32, 32>}, {pipeline_mode = #tpu.pipeline_mode<synchronous>, transform_indices = @transform_10, window_bounds = array<i64: 1, 32>}, {transform_indices = @transform_11, window_bounds = array<i64: 2, 8, 32>}]} {
    %c0 = arith.constant 0 : index
    %c0_0 = arith.constant 0 : index
    %c0_1 = arith.constant 0 : index
    %0 = vector.load %arg1[%c0, %c0_0, %c0_1] : memref<2x8x32xf32, #tpu.memory_space<vmem>>, vector<2x8x32xf32>
    %1 = vector.shape_cast %0 : vector<2x8x32xf32> to vector<16x32xf32>
    %c0_2 = arith.constant 0 : index
    %c0_3 = arith.constant 0 : index
    %c0_4 = arith.constant 0 : index
    %2 = vector.load %arg2[%c0_2, %c0_3, %c0_4] : memref<2x8x32xf32, #tpu.memory_space<vmem>>, vector<2x8x32xf32>
    %3 = vector.shape_cast %2 : vector<2x8x32xf32> to vector<16x32xf32>
    %c0_5 = arith.constant 0 : index
    %c0_6 = arith.constant 0 : index
    %c0_7 = arith.constant 0 : index
    %4 = vector.load %arg3[%c0_5, %c0_6, %c0_7] : memref<2x8x32xf32, #tpu.memory_space<vmem>>, vector<2x8x32xf32>
    %5 = vector.shape_cast %4 : vector<2x8x32xf32> to vector<16x32xf32>
    %c0_8 = arith.constant 0 : index
    %c0_9 = arith.constant 0 : index
    %6 = vector.load %arg4[%c0_8, %c0_9] : memref<32x32xf32, #tpu.memory_space<vmem>>, vector<32x32xf32>
    %cst = arith.constant dense<0.000000e+00> : vector<16x32xf32>
    %7 = tpu.matmul %1, %6, %cst {dimension_numbers = #tpu.dot_dimension_numbers<[1], [0], [0], [1], [0, 0, 1, 1], [], []>} : vector<16x32xf32>, vector<32x32xf32>, vector<16x32xf32> -> vector<16x32xf32>
    %c0_10 = arith.constant 0 : index
    %c0_11 = arith.constant 0 : index
    %8 = vector.load %arg5[%c0_10, %c0_11] : memref<1x32xf32, #tpu.memory_space<vmem>>, vector<1x32xf32>
    %9 = vector.broadcast %8 : vector<1x32xf32> to vector<16x32xf32>
    %10 = arith.addf %7, %9 : vector<16x32xf32>
    %c0_12 = arith.constant 0 : index
    %c0_13 = arith.constant 0 : index
    %11 = vector.load %arg6[%c0_12, %c0_13] : memref<32x32xf32, #tpu.memory_space<vmem>>, vector<32x32xf32>
    %cst_14 = arith.constant dense<0.000000e+00> : vector<16x32xf32>
    %12 = tpu.matmul %3, %11, %cst_14 {dimension_numbers = #tpu.dot_dimension_numbers<[1], [0], [0], [1], [0, 0, 1, 1], [], []>} : vector<16x32xf32>, vector<32x32xf32>, vector<16x32xf32> -> vector<16x32xf32>
    %c0_15 = arith.constant 0 : index
    %c0_16 = arith.constant 0 : index
    %13 = vector.load %arg7[%c0_15, %c0_16] : memref<1x32xf32, #tpu.memory_space<vmem>>, vector<1x32xf32>
    %14 = vector.broadcast %13 : vector<1x32xf32> to vector<16x32xf32>
    %15 = arith.addf %12, %14 : vector<16x32xf32>
    %c0_17 = arith.constant 0 : index
    %c0_18 = arith.constant 0 : index
    %16 = vector.load %arg8[%c0_17, %c0_18] : memref<32x32xf32, #tpu.memory_space<vmem>>, vector<32x32xf32>
    %cst_19 = arith.constant dense<0.000000e+00> : vector<16x32xf32>
    %17 = tpu.matmul %5, %16, %cst_19 {dimension_numbers = #tpu.dot_dimension_numbers<[1], [0], [0], [1], [0, 0, 1, 1], [], []>} : vector<16x32xf32>, vector<32x32xf32>, vector<16x32xf32> -> vector<16x32xf32>
    %c0_20 = arith.constant 0 : index
    %c0_21 = arith.constant 0 : index
    %18 = vector.load %arg9[%c0_20, %c0_21] : memref<1x32xf32, #tpu.memory_space<vmem>>, vector<1x32xf32>
    %19 = vector.broadcast %18 : vector<1x32xf32> to vector<16x32xf32>
    %20 = arith.addf %17, %19 : vector<16x32xf32>
    %21 = vector.shape_cast %10 : vector<16x32xf32> to vector<2x8x32xf32>
    %22 = vector.shape_cast %15 : vector<16x32xf32> to vector<2x8x32xf32>
    %23 = vector.shape_cast %20 : vector<16x32xf32> to vector<2x8x32xf32>
    %24 = tpu.iota {dimensions = array<i32: 2>} : vector<1x1x32xi32>
    %cst_22 = arith.constant 0.000000e+00 : f32
    %25 = vector.broadcast %cst_22 : f32 to vector<2x8x32xf32>
    %c0_i32 = arith.constant 0 : i32
    %26 = vector.broadcast %c0_i32 : i32 to vector<1x1x32xi32>
    %27 = arith.cmpi sge, %24, %26 : vector<1x1x32xi32>
    %c8_i32 = arith.constant 8 : i32
    %28 = vector.broadcast %c8_i32 : i32 to vector<1x1x32xi32>
    %29 = arith.cmpi slt, %24, %28 : vector<1x1x32xi32>
    %30 = arith.andi %27, %29 : vector<1x1x32xi1>
    %31 = arith.extui %30 : vector<1x1x32xi1> to vector<1x1x32xi32>
    %32 = arith.sitofp %31 : vector<1x1x32xi32> to vector<1x1x32xf32>
    %33 = vector.broadcast %32 : vector<1x1x32xf32> to vector<2x8x32xf32>
    %34 = arith.mulf %21, %33 : vector<2x8x32xf32>
    %35 = vector.broadcast %32 : vector<1x1x32xf32> to vector<2x8x32xf32>
    %36 = arith.mulf %23, %35 : vector<2x8x32xf32>
    "tpu.trace_start"() <{level = 10 : i32, message = "bqe,bke->bqk"}> : () -> ()
    %cst_23 = arith.constant dense<0.000000e+00> : vector<2x8x8xf32>
    %37 = tpu.matmul %34, %22, %cst_23 {dimension_numbers = #tpu.dot_dimension_numbers<[2], [2], [1], [1], [0, 0, 0, 1, 1, 1], [0], [0]>} : vector<2x8x32xf32>, vector<2x8x32xf32>, vector<2x8x8xf32> -> vector<2x8x8xf32>
    "tpu.trace_stop"() : () -> ()
    %cst_24 = arith.constant dense<0xFF800000> : vector<2x8xf32>
    %38 = vector.multi_reduction <maximumf>, %37, %cst_24 [2] : vector<2x8x8xf32> to vector<2x8xf32>
    %39 = vector.shape_cast %38 : vector<2x8xf32> to vector<2x8x1xf32>
    %40 = vector.broadcast %39 : vector<2x8x1xf32> to vector<2x8x8xf32>
    %41 = arith.subf %37, %40 : vector<2x8x8xf32>
    %42 = math.exp %41 : vector<2x8x8xf32>
    %cst_25 = arith.constant dense<0.000000e+00> : vector<2x8xf32>
    %43 = vector.multi_reduction <add>, %42, %cst_25 [2] : vector<2x8x8xf32> to vector<2x8xf32>
    %44 = vector.shape_cast %43 : vector<2x8xf32> to vector<2x8x1xf32>
    %45 = tpu.reciprocal %44 {approx = true} : vector<2x8x1xf32> -> vector<2x8x1xf32>
    %46 = arith.mulf %44, %45 : vector<2x8x1xf32>
    %cst_26 = arith.constant 2.000000e+00 : f32
    %47 = vector.broadcast %cst_26 : f32 to vector<2x8x1xf32>
    %48 = arith.subf %47, %46 : vector<2x8x1xf32>
    %49 = arith.mulf %45, %48 : vector<2x8x1xf32>
    %50 = vector.broadcast %49 : vector<2x8x1xf32> to vector<2x8x8xf32>
    %51 = arith.mulf %42, %50 : vector<2x8x8xf32>
    "tpu.trace_start"() <{level = 10 : i32, message = "bqk,bke->bqe"}> : () -> ()
    %cst_27 = arith.constant dense<0.000000e+00> : vector<2x8x32xf32>
    %52 = tpu.matmul %51, %36, %cst_27 {dimension_numbers = #tpu.dot_dimension_numbers<[2], [1], [1], [2], [0, 0, 0, 1, 1, 2], [0], [0]>} : vector<2x8x8xf32>, vector<2x8x32xf32>, vector<2x8x32xf32> -> vector<2x8x32xf32>
    "tpu.trace_stop"() : () -> ()
    %53 = arith.addf %25, %52 : vector<2x8x32xf32>
    %c8_i32_28 = arith.constant 8 : i32
    %54 = vector.broadcast %c8_i32_28 : i32 to vector<1x1x32xi32>
    %55 = arith.cmpi sge, %24, %54 : vector<1x1x32xi32>
    %c16_i32 = arith.constant 16 : i32
    %56 = vector.broadcast %c16_i32 : i32 to vector<1x1x32xi32>
    %57 = arith.cmpi slt, %24, %56 : vector<1x1x32xi32>
    %58 = arith.andi %55, %57 : vector<1x1x32xi1>
    %59 = arith.extui %58 : vector<1x1x32xi1> to vector<1x1x32xi32>
    %60 = arith.sitofp %59 : vector<1x1x32xi32> to vector<1x1x32xf32>
    %61 = vector.broadcast %60 : vector<1x1x32xf32> to vector<2x8x32xf32>
    %62 = arith.mulf %21, %61 : vector<2x8x32xf32>
    %63 = vector.broadcast %60 : vector<1x1x32xf32> to vector<2x8x32xf32>
    %64 = arith.mulf %23, %63 : vector<2x8x32xf32>
    "tpu.trace_start"() <{level = 10 : i32, message = "bqe,bke->bqk"}> : () -> ()
    %cst_29 = arith.constant dense<0.000000e+00> : vector<2x8x8xf32>
    %65 = tpu.matmul %62, %22, %cst_29 {dimension_numbers = #tpu.dot_dimension_numbers<[2], [2], [1], [1], [0, 0, 0, 1, 1, 1], [0], [0]>} : vector<2x8x32xf32>, vector<2x8x32xf32>, vector<2x8x8xf32> -> vector<2x8x8xf32>
    "tpu.trace_stop"() : () -> ()
    %cst_30 = arith.constant dense<0xFF800000> : vector<2x8xf32>
    %66 = vector.multi_reduction <maximumf>, %65, %cst_30 [2] : vector<2x8x8xf32> to vector<2x8xf32>
    %67 = vector.shape_cast %66 : vector<2x8xf32> to vector<2x8x1xf32>
    %68 = vector.broadcast %67 : vector<2x8x1xf32> to vector<2x8x8xf32>
    %69 = arith.subf %65, %68 : vector<2x8x8xf32>
    %70 = math.exp %69 : vector<2x8x8xf32>
    %cst_31 = arith.constant dense<0.000000e+00> : vector<2x8xf32>
    %71 = vector.multi_reduction <add>, %70, %cst_31 [2] : vector<2x8x8xf32> to vector<2x8xf32>
    %72 = vector.shape_cast %71 : vector<2x8xf32> to vector<2x8x1xf32>
    %73 = tpu.reciprocal %72 {approx = true} : vector<2x8x1xf32> -> vector<2x8x1xf32>
    %74 = arith.mulf %72, %73 : vector<2x8x1xf32>
    %cst_32 = arith.constant 2.000000e+00 : f32
    %75 = vector.broadcast %cst_32 : f32 to vector<2x8x1xf32>
    %76 = arith.subf %75, %74 : vector<2x8x1xf32>
    %77 = arith.mulf %73, %76 : vector<2x8x1xf32>
    %78 = vector.broadcast %77 : vector<2x8x1xf32> to vector<2x8x8xf32>
    %79 = arith.mulf %70, %78 : vector<2x8x8xf32>
    "tpu.trace_start"() <{level = 10 : i32, message = "bqk,bke->bqe"}> : () -> ()
    %cst_33 = arith.constant dense<0.000000e+00> : vector<2x8x32xf32>
    %80 = tpu.matmul %79, %64, %cst_33 {dimension_numbers = #tpu.dot_dimension_numbers<[2], [1], [1], [2], [0, 0, 0, 1, 1, 2], [0], [0]>} : vector<2x8x8xf32>, vector<2x8x32xf32>, vector<2x8x32xf32> -> vector<2x8x32xf32>
    "tpu.trace_stop"() : () -> ()
    %81 = arith.addf %53, %80 : vector<2x8x32xf32>
    %c16_i32_34 = arith.constant 16 : i32
    %82 = vector.broadcast %c16_i32_34 : i32 to vector<1x1x32xi32>
    %83 = arith.cmpi sge, %24, %82 : vector<1x1x32xi32>
    %c24_i32 = arith.constant 24 : i32
    %84 = vector.broadcast %c24_i32 : i32 to vector<1x1x32xi32>
    %85 = arith.cmpi slt, %24, %84 : vector<1x1x32xi32>
    %86 = arith.andi %83, %85 : vector<1x1x32xi1>
    %87 = arith.extui %86 : vector<1x1x32xi1> to vector<1x1x32xi32>
    %88 = arith.sitofp %87 : vector<1x1x32xi32> to vector<1x1x32xf32>
    %89 = vector.broadcast %88 : vector<1x1x32xf32> to vector<2x8x32xf32>
    %90 = arith.mulf %21, %89 : vector<2x8x32xf32>
    %91 = vector.broadcast %88 : vector<1x1x32xf32> to vector<2x8x32xf32>
    %92 = arith.mulf %23, %91 : vector<2x8x32xf32>
    "tpu.trace_start"() <{level = 10 : i32, message = "bqe,bke->bqk"}> : () -> ()
    %cst_35 = arith.constant dense<0.000000e+00> : vector<2x8x8xf32>
    %93 = tpu.matmul %90, %22, %cst_35 {dimension_numbers = #tpu.dot_dimension_numbers<[2], [2], [1], [1], [0, 0, 0, 1, 1, 1], [0], [0]>} : vector<2x8x32xf32>, vector<2x8x32xf32>, vector<2x8x8xf32> -> vector<2x8x8xf32>
    "tpu.trace_stop"() : () -> ()
    %cst_36 = arith.constant dense<0xFF800000> : vector<2x8xf32>
    %94 = vector.multi_reduction <maximumf>, %93, %cst_36 [2] : vector<2x8x8xf32> to vector<2x8xf32>
    %95 = vector.shape_cast %94 : vector<2x8xf32> to vector<2x8x1xf32>
    %96 = vector.broadcast %95 : vector<2x8x1xf32> to vector<2x8x8xf32>
    %97 = arith.subf %93, %96 : vector<2x8x8xf32>
    %98 = math.exp %97 : vector<2x8x8xf32>
    %cst_37 = arith.constant dense<0.000000e+00> : vector<2x8xf32>
    %99 = vector.multi_reduction <add>, %98, %cst_37 [2] : vector<2x8x8xf32> to vector<2x8xf32>
    %100 = vector.shape_cast %99 : vector<2x8xf32> to vector<2x8x1xf32>
    %101 = tpu.reciprocal %100 {approx = true} : vector<2x8x1xf32> -> vector<2x8x1xf32>
    %102 = arith.mulf %100, %101 : vector<2x8x1xf32>
    %cst_38 = arith.constant 2.000000e+00 : f32
    %103 = vector.broadcast %cst_38 : f32 to vector<2x8x1xf32>
    %104 = arith.subf %103, %102 : vector<2x8x1xf32>
    %105 = arith.mulf %101, %104 : vector<2x8x1xf32>
    %106 = vector.broadcast %105 : vector<2x8x1xf32> to vector<2x8x8xf32>
    %107 = arith.mulf %98, %106 : vector<2x8x8xf32>
    "tpu.trace_start"() <{level = 10 : i32, message = "bqk,bke->bqe"}> : () -> ()
    %cst_39 = arith.constant dense<0.000000e+00> : vector<2x8x32xf32>
    %108 = tpu.matmul %107, %92, %cst_39 {dimension_numbers = #tpu.dot_dimension_numbers<[2], [1], [1], [2], [0, 0, 0, 1, 1, 2], [0], [0]>} : vector<2x8x8xf32>, vector<2x8x32xf32>, vector<2x8x32xf32> -> vector<2x8x32xf32>
    "tpu.trace_stop"() : () -> ()
    %109 = arith.addf %81, %108 : vector<2x8x32xf32>
    %c24_i32_40 = arith.constant 24 : i32
    %110 = vector.broadcast %c24_i32_40 : i32 to vector<1x1x32xi32>
    %111 = arith.cmpi sge, %24, %110 : vector<1x1x32xi32>
    %c32_i32 = arith.constant 32 : i32
    %112 = vector.broadcast %c32_i32 : i32 to vector<1x1x32xi32>
    %113 = arith.cmpi slt, %24, %112 : vector<1x1x32xi32>
    %114 = arith.andi %111, %113 : vector<1x1x32xi1>
    %115 = arith.extui %114 : vector<1x1x32xi1> to vector<1x1x32xi32>
    %116 = arith.sitofp %115 : vector<1x1x32xi32> to vector<1x1x32xf32>
    %117 = vector.broadcast %116 : vector<1x1x32xf32> to vector<2x8x32xf32>
    %118 = arith.mulf %21, %117 : vector<2x8x32xf32>
    %119 = vector.broadcast %116 : vector<1x1x32xf32> to vector<2x8x32xf32>
    %120 = arith.mulf %23, %119 : vector<2x8x32xf32>
    "tpu.trace_start"() <{level = 10 : i32, message = "bqe,bke->bqk"}> : () -> ()
    %cst_41 = arith.constant dense<0.000000e+00> : vector<2x8x8xf32>
    %121 = tpu.matmul %118, %22, %cst_41 {dimension_numbers = #tpu.dot_dimension_numbers<[2], [2], [1], [1], [0, 0, 0, 1, 1, 1], [0], [0]>} : vector<2x8x32xf32>, vector<2x8x32xf32>, vector<2x8x8xf32> -> vector<2x8x8xf32>
    "tpu.trace_stop"() : () -> ()
    %cst_42 = arith.constant dense<0xFF800000> : vector<2x8xf32>
    %122 = vector.multi_reduction <maximumf>, %121, %cst_42 [2] : vector<2x8x8xf32> to vector<2x8xf32>
    %123 = vector.shape_cast %122 : vector<2x8xf32> to vector<2x8x1xf32>
    %124 = vector.broadcast %123 : vector<2x8x1xf32> to vector<2x8x8xf32>
    %125 = arith.subf %121, %124 : vector<2x8x8xf32>
    %126 = math.exp %125 : vector<2x8x8xf32>
    %cst_43 = arith.constant dense<0.000000e+00> : vector<2x8xf32>
    %127 = vector.multi_reduction <add>, %126, %cst_43 [2] : vector<2x8x8xf32> to vector<2x8xf32>
    %128 = vector.shape_cast %127 : vector<2x8xf32> to vector<2x8x1xf32>
    %129 = tpu.reciprocal %128 {approx = true} : vector<2x8x1xf32> -> vector<2x8x1xf32>
    %130 = arith.mulf %128, %129 : vector<2x8x1xf32>
    %cst_44 = arith.constant 2.000000e+00 : f32
    %131 = vector.broadcast %cst_44 : f32 to vector<2x8x1xf32>
    %132 = arith.subf %131, %130 : vector<2x8x1xf32>
    %133 = arith.mulf %129, %132 : vector<2x8x1xf32>
    %134 = vector.broadcast %133 : vector<2x8x1xf32> to vector<2x8x8xf32>
    %135 = arith.mulf %126, %134 : vector<2x8x8xf32>
    "tpu.trace_start"() <{level = 10 : i32, message = "bqk,bke->bqe"}> : () -> ()
    %cst_45 = arith.constant dense<0.000000e+00> : vector<2x8x32xf32>
    %136 = tpu.matmul %135, %120, %cst_45 {dimension_numbers = #tpu.dot_dimension_numbers<[2], [1], [1], [2], [0, 0, 0, 1, 1, 2], [0], [0]>} : vector<2x8x8xf32>, vector<2x8x32xf32>, vector<2x8x32xf32> -> vector<2x8x32xf32>
    "tpu.trace_stop"() : () -> ()
    %137 = arith.addf %109, %136 : vector<2x8x32xf32>
    %138 = vector.shape_cast %137 : vector<2x8x32xf32> to vector<16x32xf32>
    %c0_46 = arith.constant 0 : index
    %c0_47 = arith.constant 0 : index
    %139 = vector.load %arg10[%c0_46, %c0_47] : memref<32x32xf32, #tpu.memory_space<vmem>>, vector<32x32xf32>
    %cst_48 = arith.constant dense<0.000000e+00> : vector<16x32xf32>
    %140 = tpu.matmul %138, %139, %cst_48 {dimension_numbers = #tpu.dot_dimension_numbers<[1], [0], [0], [1], [0, 0, 1, 1], [], []>} : vector<16x32xf32>, vector<32x32xf32>, vector<16x32xf32> -> vector<16x32xf32>
    %c0_49 = arith.constant 0 : index
    %c0_50 = arith.constant 0 : index
    %141 = vector.load %arg11[%c0_49, %c0_50] : memref<1x32xf32, #tpu.memory_space<vmem>>, vector<1x32xf32>
    %142 = vector.broadcast %141 : vector<1x32xf32> to vector<16x32xf32>
    %143 = arith.addf %140, %142 : vector<16x32xf32>
    %144 = vector.shape_cast %143 : vector<16x32xf32> to vector<2x8x32xf32>
    %c0_51 = arith.constant 0 : index
    %c0_52 = arith.constant 0 : index
    %c0_53 = arith.constant 0 : index
    %145 = vector.load %arg12[%c0_51, %c0_52, %c0_53] : memref<2x8x32xf32, #tpu.memory_space<vmem>>, vector<2x8x32xf32>
    tpu.vector_store %arg12[%c0_51, %c0_52, %c0_53], %144 {strides = array<i32>} : memref<2x8x32xf32, #tpu.memory_space<vmem>>, vector<2x8x32xf32>,
    return
  }
  func.func @transform_0(%arg0: i32) -> (i32, i32, i32) {
    %c0_i32 = arith.constant 0 : i32
    %c0_i32_0 = arith.constant 0 : i32
    %c0_i32_1 = arith.constant 0 : i32
    return %arg0, %c0_i32, %c0_i32_0 : i32, i32, i32
  }
  func.func @transform_1(%arg0: i32) -> (i32, i32, i32) {
    %c0_i32 = arith.constant 0 : i32
    %c0_i32_0 = arith.constant 0 : i32
    %c0_i32_1 = arith.constant 0 : i32
    return %arg0, %c0_i32, %c0_i32_0 : i32, i32, i32
  }
  func.func @transform_2(%arg0: i32) -> (i32, i32, i32) {
    %c0_i32 = arith.constant 0 : i32
    %c0_i32_0 = arith.constant 0 : i32
    %c0_i32_1 = arith.constant 0 : i32
    return %arg0, %c0_i32, %c0_i32_0 : i32, i32, i32
  }
  func.func @transform_3(%arg0: i32) -> (i32, i32) {
    %c0_i32 = arith.constant 0 : i32
    %c0_i32_0 = arith.constant 0 : i32
    %c0_i32_1 = arith.constant 0 : i32
    return %c0_i32, %c0_i32_0 : i32, i32
  }
  func.func @transform_4(%arg0: i32) -> (i32, i32) {
    %c0_i32 = arith.constant 0 : i32
    %c0_i32_0 = arith.constant 0 : i32
    %c0_i32_1 = arith.constant 0 : i32
    return %c0_i32, %c0_i32_0 : i32, i32
  }
  func.func @transform_5(%arg0: i32) -> (i32, i32) {
    %c0_i32 = arith.constant 0 : i32
    %c0_i32_0 = arith.constant 0 : i32
    %c0_i32_1 = arith.constant 0 : i32
    return %c0_i32, %c0_i32_0 : i32, i32
  }
  func.func @transform_6(%arg0: i32) -> (i32, i32) {
    %c0_i32 = arith.constant 0 : i32
    %c0_i32_0 = arith.constant 0 : i32
    %c0_i32_1 = arith.constant 0 : i32
    return %c0_i32, %c0_i32_0 : i32, i32
  }
  func.func @transform_7(%arg0: i32) -> (i32, i32) {
    %c0_i32 = arith.constant 0 : i32
    %c0_i32_0 = arith.constant 0 : i32
    %c0_i32_1 = arith.constant 0 : i32
    return %c0_i32, %c0_i32_0 : i32, i32
  }
  func.func @transform_8(%arg0: i32) -> (i32, i32) {
    %c0_i32 = arith.constant 0 : i32
    %c0_i32_0 = arith.constant 0 : i32
    %c0_i32_1 = arith.constant 0 : i32
    return %c0_i32, %c0_i32_0 : i32, i32
  }
  func.func @transform_9(%arg0: i32) -> (i32, i32) {
    %c0_i32 = arith.constant 0 : i32
    %c0_i32_0 = arith.constant 0 : i32
    %c0_i32_1 = arith.constant 0 : i32
    return %c0_i32, %c0_i32_0 : i32, i32
  }
  func.func @transform_10(%arg0: i32) -> (i32, i32) {
    %c0_i32 = arith.constant 0 : i32
    %c0_i32_0 = arith.constant 0 : i32
    %c0_i32_1 = arith.constant 0 : i32
    return %c0_i32, %c0_i32_0 : i32, i32
  }
  func.func @transform_11(%arg0: i32) -> (i32, i32, i32) {
    %c0_i32 = arith.constant 0 : i32
    %c0_i32_0 = arith.constant 0 : i32
    %c0_i32_1 = arith.constant 0 : i32
    return %arg0, %c0_i32, %c0_i32_0 : i32, i32, i32
  }
}

</mosaic_0001>

<bundles_post_ra>
// kernel: tpu_custom_call.1
= control target key start
LH: loop header
LB: loop body
LE: loop exit
PB: predicated region body
PF: predicated region fallthrough
CT: control target
= control target key end

     0   :  { %16 = vsyncpa [#allocation3], 0  ;;  %s2739_s0 = inlined_call_operand.hbm [shape: f32[2,8,32], index: 0, kind: input, shape index: {}]   ;;  %s2740_s1 = inlined_call_operand.hbm [shape: f32[2,8,32], index: 1, kind: input, shape index: {}]   ;;  %s2741_s2 = inlined_call_operand.hbm [shape: f32[2,8,32], index: 2, kind: input, shape index: {}]   ;;  %s2742_s3 = inlined_call_operand.hbm [shape: f32[32,32], index: 3, kind: input, shape index: {}]   ;;  %s2743_s4 = inlined_call_operand.vmem [shape: f32[1,32], index: 4, kind: input, shape index: {}]   ;;  %s2744_s5 = inlined_call_operand.hbm [shape: f32[32,32], index: 5, kind: input, shape index: {}]   ;;  %s2745_s6 = inlined_call_operand.vmem [shape: f32[1,32], index: 6, kind: input, shape index: {}]   ;;  %s2746_s7 = inlined_call_operand.hbm [shape: f32[32,32], index: 7, kind: input, shape index: {}]   ;;  %s2747_s8 = inlined_call_operand.hbm [shape: f32[1,32], index: 8, kind: input, shape index: {}]   ;;  %s2748_s9 = inlined_call_operand.vmem [shape: f32[32,32], index: 9, kind: input, shape index: {}]   ;;  %s2749_s10 = inlined_call_operand.vmem [shape: f32[1,32], index: 10, kind: input, shape index: {}]   ;;  %s2750_s11 = inlined_call_operand.hbm [shape: f32[2,8,32], index: 11, kind: output, shape index: {}]  }
   0x1   :  { %17 = vsyncpa [#allocation6], 0 }
   0x2   :  { %18 = vsyncpa [#allocation9], 0 }
   0x3   :  { %19 = vsyncpa [#allocation12], 0 }
   0x4   :  { %20 = vsyncpa [#allocation4], 0  ;;  %s2352_s17 = smov [#allocation5]   ;;  %s2353_s19 = smov [#allocation8]  }
   0x5   :  { %s38_s18 = sshll.u32 %s2352_s17, 4  ;;  %s62_s20 = sshll.u32 %s2353_s19, 4  ;;  %s39_s18 = int_to_ptr.vmem [resolvable:$true] %s38_s18  ;;  %s2424_s20 = int_to_ptr.vmem [resolvable:$true] %s62_s20 }
   0x6   :  { %s2166_s23 = scalar_lea.hbm %s2740_s1, 256 }
   0x7   :  { %p2167_p0 = scmp.ne.s32.totalorder %s2740_s1, %s2166_s23  ;;  %p2170_p1 = scmp.lt.u32.totalorder %s2166_s23, %s2740_s1 }
   0x9   :  { %p2172_p2 = pnand %p2170_p1, %p2167_p0 }
   0xb   :  { %2175 = shalt.err (!%p2172_p2)
}
   0xc   :  { %s2176_s28 = scalar_lea.vmem %s39_s18, 256  ;;  %p2181_p4 = scmp.lt.s32.totalorder %s39_s18, %s39_s18 }
   0xd   :  { %p2177_p3 = scmp.ne.s32.totalorder %s39_s18, %s2176_s28  ;;  %p2182_p5 = scmp.lt.s32.totalorder %s2176_s28, %s2176_s28 }
   0xf   :  { %p2183_p6 = por %p2182_p5, %p2181_p4 }
  0x11   :  { %p2184_p7 = pnand %p2183_p6, %p2177_p3 }
  0x13   :  { %2187 = shalt.err (!%p2184_p7)
}
  0x14   :  { %s2354_s29 = smov 128   ;;  %s2355_s30 = smov 8  }
  0x15   :  { %44 = dma.hbm_to_vmem [thread:$0]  %s2740_s1, 256, %s39_s18, [#allocation6], %s2354_s29, %s2354_s29, %s2355_s30  }
  0x16   :  { %s2188_s16 = scalar_lea.hbm %s2742_s3, 512 }
  0x17   :  { %p2189_p8 = scmp.ne.s32.totalorder %s2742_s3, %s2188_s16  ;;  %p2192_p9 = scmp.lt.u32.totalorder %s2188_s16, %s2742_s3 }
  0x19   :  { %p2194_p10 = pnand %p2192_p9, %p2189_p8 }
  0x1b   :  { %2197 = shalt.err (!%p2194_p10)
}
  0x1c   :  { %s2198_s23 = scalar_lea.vmem %s2424_s20, 512  ;;  %p2203_p12 = scmp.lt.s32.totalorder %s2424_s20, %s2424_s20 }
  0x1d   :  { %p2199_p11 = scmp.ne.s32.totalorder %s2424_s20, %s2198_s23  ;;  %p2204_p13 = scmp.lt.s32.totalorder %s2198_s23, %s2198_s23 }
  0x1f   :  { %p2205_p0 = por %p2204_p13, %p2203_p12 }
  0x21   :  { %p2206_p1 = pnand %p2205_p0, %p2199_p11 }
  0x23   :  { %2209 = shalt.err (!%p2206_p1)
}
  0x24   :  { %68 = dma.hbm_to_vmem [thread:$0]  %s2742_s3, 512, %s2424_s20, [#allocation9], %s2354_s29, %s2354_s29, %s2355_s30  }
  0x25   :  { %s2356_s24 = smov [#allocation11]   ;;  %s2357_s26 = smov [#allocation2]  }
  0x26   :  { %s90_s25 = sshll.u32 %s2356_s24, 4  ;;  %s26_s27 = sshll.u32 %s2357_s26, 4  ;;  %s91_s25 = int_to_ptr.vmem [resolvable:$true] %s90_s25  ;;  %s2461_s27 = int_to_ptr.vmem [resolvable:$true] %s26_s27 }
  0x27   :  { %s2210_s13 = scalar_lea.hbm %s2746_s7, 512 }
  0x28   :  { %p2211_p2 = scmp.ne.s32.totalorder %s2746_s7, %s2210_s13  ;;  %p2214_p3 = scmp.lt.u32.totalorder %s2210_s13, %s2746_s7 }
  0x2a   :  { %p2216_p4 = pnand %p2214_p3, %p2211_p2 }
  0x2c   :  { %2219 = shalt.err (!%p2216_p4)
}
  0x2d   :  { %s2220_s3 = scalar_lea.vmem %s91_s25, 512  ;;  %p2225_p6 = scmp.lt.s32.totalorder %s91_s25, %s91_s25 }
  0x2e   :  { %p2221_p5 = scmp.ne.s32.totalorder %s91_s25, %s2220_s3  ;;  %p2226_p7 = scmp.lt.s32.totalorder %s2220_s3, %s2220_s3 }
  0x30   :  { %p2227_p8 = por %p2226_p7, %p2225_p6 }
  0x32   :  { %p2228_p9 = pnand %p2227_p8, %p2221_p5 }
  0x34   :  { %2231 = shalt.err (!%p2228_p9)
}
  0x35   :  { %96 = dma.hbm_to_vmem [thread:$0]  %s2746_s7, 512, %s91_s25, [#allocation12], %s2354_s29, %s2354_s29, %s2355_s30  }
  0x36   :  { %s2232_s23 = scalar_lea.hbm %s2739_s0, 256 }
  0x37   :  { %p2233_p10 = scmp.ne.s32.totalorder %s2739_s0, %s2232_s23  ;;  %p2236_p11 = scmp.lt.u32.totalorder %s2232_s23, %s2739_s0 }
  0x39   :  { %p2238_p12 = pnand %p2236_p11, %p2233_p10 }
  0x3b   :  { %2241 = shalt.err (!%p2238_p12)
}
  0x3c   :  { %s2242_s28 = scalar_lea.vmem %s2461_s27, 256  ;;  %p2247_p0 = scmp.lt.s32.totalorder %s2461_s27, %s2461_s27 }
  0x3d   :  { %p2243_p13 = scmp.ne.s32.totalorder %s2461_s27, %s2242_s28  ;;  %p2248_p1 = scmp.lt.s32.totalorder %s2242_s28, %s2242_s28 }
  0x3f   :  { %p2249_p2 = por %p2248_p1, %p2247_p0 }
  0x41   :  { %p2250_p3 = pnand %p2249_p2, %p2243_p13 }
  0x43   :  { %2253 = shalt.err (!%p2250_p3)
}
  0x44   :  { %32 = dma.hbm_to_vmem [thread:$0]  %s2739_s0, 256, %s2461_s27, [#allocation3], %s2354_s29, %s2354_s29, %s2355_s30  }
  0x45   :  { %s2358_s12 = smov [#allocation7]   ;;  %s2359_s14 = smov [#allocation10]  }
  0x46   :  { %s50_s13 = sshll.u32 %s2358_s12, 4  ;;  %s76_s15 = sshll.u32 %s2359_s14, 4  ;;  %s51_s13 = int_to_ptr.vmem [resolvable:$true] %s50_s13  ;;  %s2498_s15 = int_to_ptr.vmem [resolvable:$true] %s76_s15 }
  0x47   :  { %s2254_s3 = scalar_lea.hbm %s2741_s2, 256 }
  0x48   :  { %p2255_p4 = scmp.ne.s32.totalorder %s2741_s2, %s2254_s3  ;;  %p2258_p5 = scmp.lt.u32.totalorder %s2254_s3, %s2741_s2 }
  0x4a   :  { %p2260_p6 = pnand %p2258_p5, %p2255_p4 }
  0x4c   :  { %2263 = shalt.err (!%p2260_p6)
}
  0x4d   :  { %s2264_s0 = scalar_lea.vmem %s51_s13, 256  ;;  %p2269_p8 = scmp.lt.s32.totalorder %s51_s13, %s51_s13 }
  0x4e   :  { %p2265_p7 = scmp.ne.s32.totalorder %s51_s13, %s2264_s0  ;;  %p2270_p9 = scmp.lt.s32.totalorder %s2264_s0, %s2264_s0 }
  0x50   :  { %p2271_p10 = por %p2270_p9, %p2269_p8 }
  0x52   :  { %p2272_p11 = pnand %p2271_p10, %p2265_p7 }
  0x54   :  { %2275 = shalt.err (!%p2272_p11)
}
  0x55   :  { %56 = dma.hbm_to_vmem [thread:$0]  %s2741_s2, 256, %s51_s13, [#allocation6], %s2354_s29, %s2354_s29, %s2355_s30  }
  0x56   :  { %s2276_s24 = scalar_lea.hbm %s2744_s5, 512 }
  0x57   :  { %p2277_p12 = scmp.ne.s32.totalorder %s2744_s5, %s2276_s24  ;;  %p2280_p13 = scmp.lt.u32.totalorder %s2276_s24, %s2744_s5 }
  0x59   :  { %p2282_p0 = pnand %p2280_p13, %p2277_p12 }
  0x5b   :  { %2285 = shalt.err (!%p2282_p0)
}
  0x5c   :  { %s2286_s12 = scalar_lea.vmem %s2498_s15, 512  ;;  %p2291_p2 = scmp.lt.s32.totalorder %s2498_s15, %s2498_s15 }
  0x5d   :  { %p2287_p1 = scmp.ne.s32.totalorder %s2498_s15, %s2286_s12  ;;  %p2292_p3 = scmp.lt.s32.totalorder %s2286_s12, %s2286_s12 }
  0x5f   :  { %p2293_p4 = por %p2292_p3, %p2291_p2 }
  0x61   :  { %p2294_p5 = pnand %p2293_p4, %p2287_p1 }
  0x63   :  { %2297 = shalt.err (!%p2294_p5)
}
  0x64   :  { %82 = dma.hbm_to_vmem [thread:$0]  %s2744_s5, 512, %s2498_s15, [#allocation9], %s2354_s29, %s2354_s29, %s2355_s30  }
  0x65   :  { %s2360_s14 = smov [#allocation13]   ;;  %s2298_s20 = scalar_lea.hbm %s2747_s8, 16 }
  0x66   :  { %s103_s16 = sshll.u32 %s2360_s14, 4  ;;  %p2299_p6 = scmp.ne.s32.totalorder %s2747_s8, %s2298_s20  ;;  %s104_s16 = int_to_ptr.vmem [resolvable:$true] %s103_s16 }
  0x67   :  { %p2302_p7 = scmp.lt.u32.totalorder %s2298_s20, %s2747_s8 }
  0x69   :  { %p2304_p8 = pnand %p2302_p7, %p2299_p6 }
  0x6b   :  { %2307 = shalt.err (!%p2304_p8)
}
  0x6c   :  { %s2308_s27 = scalar_lea.vmem %s104_s16, 16  ;;  %s2312_s5 = scalar_lea.vmem %s104_s16, 32 }
  0x6d   :  { %p2309_p9 = scmp.ne.s32.totalorder %s104_s16, %s2308_s27  ;;  %p2313_p10 = scmp.lt.s32.totalorder %s104_s16, %s104_s16 }
  0x6e   :  { %p2314_p11 = scmp.lt.s32.totalorder %s2312_s5, %s2308_s27 }
  0x70   :  { %p2315_p12 = por %p2314_p11, %p2313_p10 }
  0x72   :  { %p2316_p13 = pnand %p2315_p12, %p2309_p9 }
  0x74   :  { %2319 = shalt.err (!%p2316_p13)
}
  0x75   :  { %106 = dma.hbm_to_vmem [thread:$0]  %s2747_s8, 16, %s104_s16, [#allocation12]  }
  0x76   :  { %2342 = dma.done.wait [#allocation3], 256  }
  0x77   :  { %2343 = vsyncadd [#allocation3], 4294967040 }
  0x78   :  { %2344 = dma.done.wait [#allocation6], 512  }
  0x79   :  { %2345 = vsyncadd [#allocation6], 4294966784 }
  0x7a   :  { %2346 = dma.done.wait [#allocation9], 1024  }
  0x7b   :  { %2347 = vsyncadd [#allocation9], 4294966272 }
  0x7c   :  { %2348 = dma.done.wait [#allocation12], 528  }
  0x7d   :  { %2349 = vsyncadd [#allocation12], 4294966768  ;;  %v231_v0 = vld [vmem:[#allocation10] sm:$0xff]  ;;  %v232_v1 = vld [vmem:[#allocation10 + $0x8] sm:$0xff]  ;;  %vm149_vm0 = vcmask 261120   ;;  %v2361_v16 = vmov 0.0   ;;  %v415_v17 = vlaneseq }
  0x7e   :  { %v138_v2 = vld [vmem:[#allocation8] sm:$0xff]  ;;  %v2086_v3 = vpack.c.bf16 %v232_v1, %v231_v0  ;;  %v139_v4 = vld [vmem:[#allocation8 + $0x8] sm:$0xff]  ;;  %v233_v5 = vld [vmem:[#allocation10 + $0x10] sm:$0xff]  ;;  %vm2362_vm1 = vmmov 0   ;;  %vm578_vm12 = vcmask 64512   ;;  %s2363_s16 = smov [#allocation14]  }
  0x7f   :  { %v234_v6 = vld [vmem:[#allocation10 + $0x18] sm:$0xff]  ;;  %v2078_v7 = vpack.c.bf16 %v139_v4, %v138_v2  ;;  %v140_v9 = vld [vmem:[#allocation8 + $0x10] sm:$0xff]  ;;  %v134_v11 = vld [vmem:[#allocation5] sm:$0xff]  ;;  %v416_v18 = vand.u32 127, %v415_v17  ;;  %s1843_s17 = sshll.u32 %s2363_s16, 4  ;;  %s1844_s17 = int_to_ptr.vmem [resolvable:$true] %s1843_s17 }
  0x80   :  { %v2090_v8 = vpack.c.bf16 %v234_v6, %v233_v5  ;;  %v141_v10 = vld [vmem:[#allocation8 + $0x18] sm:$0xff]  ;;  %2087 = vmatprep.subr.bf16.mxu1 %v2086_v3  ;;  %1973 = vmatprep.mubr.msk.f32.mxu1 %vm149_vm0, %v134_v11  ;;  %v132_v13 = vld [vmem:[#allocation2] sm:$0xff]  ;;  %v135_v14 = vld [vmem:[#allocation5 + $0x8] sm:$0xff]  ;;  %p2325_p1 = scmp.lt.s32.totalorder %s1844_s17, %s1844_s17 }
  0x81   :  { %v2082_v12 = vpack.c.bf16 %v141_v10, %v140_v9  ;;  %2079 = vmatprep.subr.bf16.mxu0 %v2078_v7  ;;  %2089 = vmatpush3.bf16.msra.mxu1 %v2086_v3  ;;  %v133_v15 = vld [vmem:[#allocation2 + $0x8] sm:$0xff]  ;;  %vm1082_vm2 = vcmp.ge.s32.totalorder %v416_v18, 16  ;;  %vm1083_vm3 = vcmp.lt.s32.totalorder %v416_v18, 24  ;;  %vm1413_vm4 = vcmp.ge.s32.totalorder %v416_v18, 24  ;;  %v1861_v19 = vld [vmem:[%s2745_s6] ss:$0 sm:$0xff] }
  0x82   :  { %2081 = vmatpush3.bf16.msra.mxu0 %v2078_v7  ;;  %2091 = vmatprep.subr.bf16.mxu1 %v2090_v8  ;;  %vm1414_vm5 = vcmp.lt.s32.totalorder %v416_v18, 32  ;;  %vm1084_vm6 = vmand %vm1082_vm2, %vm1083_vm3  ;;  %v1858_v20 = vld [vmem:[%s2743_s4] ss:$0 sm:$0xff]  ;;  %vm418_vm8 = vcmp.lt.s32.totalorder %v416_v18, 8  ;;  %vm607_vm9 = vcmp.ge.s32.totalorder %v416_v18, 8  ;;  %vm608_vm10 = vcmp.lt.s32.totalorder %v416_v18, 16 }
  0x83   :  { %2083 = vmatprep.subr.bf16.mxu0 %v2082_v12  ;;  %1962 = vmatprep.mubr.msk.f32.mxu0 %vm149_vm0, %v132_v13  ;;  %vm1415_vm7 = vmand %vm1413_vm4, %vm1414_vm5  ;;  %v2561_v23 = vsel %vm1084_vm6, 1.0, %v2361_v16  ;;  %v2567_v27 = vsel %vm418_vm8, 1.0, %v2361_v16  ;;  %v323_v41 = vld [vmem:[#allocation11] sm:$0xff]  ;;  %v324_v42 = vld [vmem:[#allocation11 + $0x8] sm:$0xff] }
  0x84   :  { %v2564_v24 = vsel %vm1415_vm7, 1.0, %v2361_v16  ;;  %vm609_vm11 = vmand %vm607_vm9, %vm608_vm10  ;;  %v325_v43 = vld [vmem:[#allocation11 + $0x10] sm:$0xff]  ;;  %v2094_v44 = vpack.c.bf16 %v324_v42, %v323_v41  ;;  %v326_v45 = vld [vmem:[#allocation11 + $0x18] sm:$0xff] }
  0x85   :  { %2093 = vmatpush3.bf16.msra.mxu1 %v2090_v8  ;;  %v2597_v38 = vsel %vm609_vm11, 1.0, %v2361_v16  ;;  %v136_v46 = vld [vmem:[#allocation7] sm:$0xff]  ;;  %v2098_v47 = vpack.c.bf16 %v326_v45, %v325_v43  ;;  %v137_v48 = vld [vmem:[#allocation7 + $0x8] sm:$0xff] }
  0x86   :  { %2085 = vmatpush3.bf16.msra.mxu0 %v2082_v12  ;;  %1987 = vmatprep.subr.mxu1 %v2361_v16 }
  0x87   :  { %2095 = vmatprep.subr.bf16.mxu0 %v2094_v44 }
  0x88   :  { %1974 = vmatmul.mubr.msk.f32.vlgmr.msra.gmra.mrb[0].mxu1 %vm149_vm0, %v135_v14 }
  0x89   :  { %1963 = vmatmul.mubr.msk.f32.vlgmr.msra.gmra.mrb[0].mxu0 %vm149_vm0, %v133_v15  ;;  %1989 = vmatprep.mubr.msk.f32.mxu1 %vm2362_vm1, %v2361_v16 }
  0x8a   :  { %1984 = vmatprep.mubr.msk.f32.mxu0 %vm149_vm0, %v136_v46  ;;  %2097 = vmatpush3.bf16.msra.mxu0 %v2094_v44 }
  0x8b   :  { %2099 = vmatprep.subr.bf16.mxu0 %v2098_v47 }
  0x8e   :  { %2101 = vmatpush3.bf16.msra.mxu0 %v2098_v47 }
  0x8f   :  { %2007 = vmatprep.subr.mxu0 %v2361_v16 }
  0x91   :  { %1985 = vmatmul.mubr.msk.f32.vlgmr.msra.gmra.mrb[2].mxu0 %vm149_vm0, %v137_v48 }
  0x92   :  { %2009 = vmatprep.mubr.msk.f32.mxu0 %vm2362_vm1, %v2361_v16 }
 0x15b   :  { %v1975_v21 = vpop.f32.mrb[0].mxu1 }
 0x15c   :  { %v1964_v22 = vpop.f32.mrb[0].mxu0  ;;  %v314_v25 = vpop.f32.mrb[1].mxu1  ;;  %v2587_v36 = vadd.f32 %v1975_v21, %v1861_v19 }
 0x15d   :  { %v228_v26 = vadd.f32 %v1964_v22, %v1858_v20  ;;  %v2569_v28 = vadd.f32 %v1861_v19, %v314_v25  ;;  %v222_v29 = vpop.f32.mrb[1].mxu0  ;;  %v1864_v19 = vld [vmem:[#allocation13] ss:$0 sm:$0xff] }
 0x15e   :  { %v223_v30 = vadd.f32 %v1858_v20, %v222_v29 }
 0x15f   :  { %v2572_v31 = vmul.f32 %v2561_v23, %v228_v26  ;;  %v2575_v32 = vmul.f32 %v2564_v24, %v228_v26  ;;  %1988 = vmatpush3.xpose.msk.msra.mxu1 %vm149_vm0, %v2569_v28  ;;  %v423_v37 = vmul.f32 %v2567_v27, %v228_v26  ;;  %v613_v40 = vmul.f32 %v2597_v38, %v228_v26 }
 0x160   :  { %v422_v33 = vmul.f32 %v2567_v27, %v223_v30  ;;  %v2581_v34 = vmul.f32 %v2561_v23, %v223_v30  ;;  %v2584_v35 = vmul.f32 %v2564_v24, %v223_v30  ;;  %1992 = vmatprep.subr.mxu1 %v2361_v16  ;;  %v612_v39 = vmul.f32 %v2597_v38, %v223_v30 }
 0x162   :  { %1990 = vmatmul.mubr.msk.f32.vlgmr.msra.gmra.mrb[2].mxu1 %vm149_vm0, %v422_v33 }
 0x163   :  { %1993 = vmatpush3.xpose.msk.msra.mxu1 %vm149_vm0, %v2587_v36  ;;  %1994 = vmatprep.mubr.msk.f32.mxu1 %vm2362_vm1, %v2361_v16 }
 0x164   :  { %1997 = vmatprep.subr.mxu1 %v2361_v16  ;;  %v1986_v18 = vpop.f32.mrb[2].mxu0 }
 0x165   :  { %v406_v20 = vpop.f32.mrb[3].mxu0  ;;  %v412_v22 = vadd.f32 %v1986_v18, %v1864_v19 }
 0x166   :  { %1995 = vmatmul.mubr.msk.f32.vlgmr.msra.gmra.mrb[4].mxu1 %vm149_vm0, %v423_v37  ;;  %v407_v21 = vadd.f32 %v1864_v19, %v406_v20 }
 0x167   :  { %1998 = vmatpush3.xpose.msk.msra.mxu1 %vm149_vm0, %v2569_v28  ;;  %1999 = vmatprep.mubr.msk.f32.mxu1 %vm2362_vm1, %v2361_v16  ;;  %v615_v26 = vmul.f32 %v2597_v38, %v412_v22  ;;  %v1090_v30 = vmul.f32 %v2561_v23, %v412_v22  ;;  %v2638_v37 = vmul.f32 %v2564_v24, %v412_v22 }
 0x168   :  { %2002 = vmatprep.subr.mxu1 %v2361_v16  ;;  %v614_v25 = vmul.f32 %v2597_v38, %v407_v21  ;;  %v1089_v29 = vmul.f32 %v2561_v23, %v407_v21  ;;  %v2635_v33 = vmul.f32 %v2564_v24, %v407_v21  ;;  %v424_v48 = vmul.f32 %v2567_v27, %v407_v21 }
 0x16a   :  { %2000 = vmatmul.mubr.msk.f32.vlgmr.msra.gmra.mrb[6].mxu1 %vm149_vm0, %v612_v39  ;;  %2008 = vmatpush3.msra.mxu0 %v614_v25 }
 0x16b   :  { %2003 = vmatpush3.xpose.msk.msra.mxu1 %vm149_vm0, %v2587_v36  ;;  %2004 = vmatprep.mubr.msk.f32.mxu1 %vm2362_vm1, %v2361_v16 }
 0x16c   :  { %2012 = vmatprep.subr.mxu1 %v2361_v16  ;;  %2017 = vmatprep.subr.mxu0 %v2361_v16 }
 0x16e   :  { %2005 = vmatmul.mubr.msk.f32.vlgmr.msra.gmra.mrb[8].mxu1 %vm149_vm0, %v613_v40 }
 0x16f   :  { %2014 = vmatprep.mubr.msk.f32.mxu1 %vm2362_vm1, %v2361_v16  ;;  %2013 = vmatpush3.msra.mxu1 %v615_v26 }
 0x170   :  { %2022 = vmatprep.subr.mxu1 %v2361_v16 }
 0x235   :  { %v498_v49 = vpop.f32.mrb[2].mxu1 }
 0x236   :  { %v1991_v50 = vpop.f32.mrb[3].mxu1  ;;  %v579_v51 = vsel %vm578_vm12, %v498_v49, -inf }
 0x237   :  { %580 = vmax.xlane.f32.xlu1 %v579_v51 }
 0x239   :  { %v574_v52 = vpop.f32.mrb[4].mxu1 }
 0x23a   :  { %v1996_v53 = vpop.f32.mrb[5].mxu1  ;;  %v582_v54 = vsel %vm578_vm12, %v574_v52, -inf }
 0x23b   :  { %583 = vmax.xlane.f32.xlu1 %v582_v54 }
 0x23d   :  { %v685_v55 = vpop.f32.mrb[6].mxu1 }
 0x23e   :  { %v2001_v56 = vpop.f32.mrb[7].mxu1  ;;  %v762_v57 = vsel %vm578_vm12, %v685_v55, -inf }
 0x23f   :  { %763 = vmax.xlane.f32.xlu0 %v762_v57 }
 0x241   :  { %v758_v58 = vpop.f32.mrb[8].mxu1 }
 0x242   :  { %v2006_v59 = vpop.f32.mrb[9].mxu1  ;;  %v765_v60 = vsel %vm578_vm12, %v758_v58, -inf }
 0x243   :  { %766 = vmax.xlane.f32.xlu0 %v765_v60 }
 0x2c4   :  { %v581_v61 = vpop.xlane.xlu1 %580 }
 0x2c5   :  { %v585_v62 = vsub.f32 %v498_v49, %v581_v61 }
 0x2c7   :  { %v587_v2 = vmul.f32 1.442695, %v585_v62 }
 0x2c8   :  { %v584_v63 = vpop.xlane.xlu1 %583 }
 0x2c9   :  { %v586_v3 = vsub.f32 %v574_v52, %v584_v63 }
 0x2cb   :  { %v589_v7 = vmul.f32 1.442695, %v586_v3 }
 0x2cc   :  { %v764_v0 = vpop.xlane.xlu0 %763 }
 0x2cd   :  { %v768_v1 = vsub.f32 %v685_v55, %v764_v0 }
 0x2cf   :  { %v770_v4 = vmul.f32 1.442695, %v768_v1 }
 0x2d0   :  { %v767_v5 = vpop.xlane.xlu0 %766 }
 0x2d1   :  { %2134 = vpow2.f32 %v770_v4  ;;  %v769_v6 = vsub.f32 %v758_v58, %v767_v5  ;;  %v425_v58 = vmul.f32 %v2567_v27, %v412_v22 }
 0x2d2   :  { %2136 = vpow2.f32 %v587_v2 }
 0x2d3   :  { %v772_v8 = vmul.f32 1.442695, %v769_v6 }
 0x2d5   :  { %2138 = vpow2.f32 %v772_v8 }
 0x2d6   :  { %2140 = vpow2.f32 %v589_v7 }
 0x2db   :  { %v2135_v9 = vpop.eup %2134 }
 0x2dc   :  { %v774_v10 = vsel %vm578_vm12, %v2135_v9, 0.0  ;;  %v2137_v11 = vpop.eup %2136 }
 0x2dd   :  { %775 = vadd.xlane.f32.xlu0 %v774_v10  ;;  %v591_v13 = vsel %vm578_vm12, %v2137_v11, 0.0 }
 0x2df   :  { %v2139_v12 = vpop.eup %2138 }
 0x2e0   :  { %v777_v14 = vsel %vm578_vm12, %v2139_v12, 0.0  ;;  %v2141_v15 = vpop.eup %2140 }
 0x2e1   :  { %592 = vadd.xlane.f32.xlu0 %v591_v13  ;;  %778 = vadd.xlane.f32.xlu1 %v777_v14  ;;  %v594_v17 = vsel %vm578_vm12, %v2141_v15, 0.0 }
 0x2e5   :  { %595 = vadd.xlane.f32.xlu1 %v594_v17 }
 0x36a   :  { %v776_v39 = vpop.xlane.xlu0 %775 }
 0x36b   :  { %2142 = vrcp.f32 %v776_v39 }
 0x36e   :  { %v779_v40 = vpop.xlane.xlu1 %778  ;;  %v593_v41 = vpop.xlane.xlu0 %592 }
 0x36f   :  { %2144 = vrcp.f32 %v779_v40 }
 0x370   :  { %2146 = vrcp.f32 %v593_v41 }
 0x372   :  { %v596_v38 = vpop.xlane.xlu1 %595 }
 0x373   :  { %2148 = vrcp.f32 %v596_v38 }
 0x375   :  { %v2143_v42 = vpop.eup %2142 }
 0x376   :  { %v782_v43 = vmul.f32 %v2143_v42, %v776_v39 }
 0x378   :  { %v784_v23 = vsub.f32 2.0, %v782_v43 }
 0x379   :  { %v2145_v44 = vpop.eup %2144 }
 0x37a   :  { %v2147_v45 = vpop.eup %2146  ;;  %v786_v46 = vmul.f32 %v2143_v42, %v784_v23  ;;  %v783_v47 = vmul.f32 %v2145_v44, %v779_v40  ;;  %v1744_v23 = vld [vmem:[%s2748_s9] sm:$0xff] }
 0x37b   :  { %v599_v24 = vmul.f32 %v2147_v45, %v593_v41 }
 0x37c   :  { %v788_v49 = vmul.f32 %v2135_v9, %v786_v46  ;;  %v785_v50 = vsub.f32 2.0, %v783_v47 }
 0x37d   :  { %v2149_v51 = vpop.eup %2148  ;;  %v601_v52 = vsub.f32 2.0, %v599_v24 }
 0x37e   :  { %v787_v53 = vmul.f32 %v2145_v44, %v785_v50  ;;  %v600_v54 = vmul.f32 %v2149_v51, %v596_v38  ;;  %2010 = vmatmul.mubr.msk.f32.vlgmr.msra.gmra.mrb[4].mxu0 %vm578_vm12, %v788_v49  ;;  %v1745_v44 = vld [vmem:[%s2748_s9 + $0x8] sm:$0xff] }
 0x37f   :  { %2018 = vmatpush3.msra.mxu0 %v424_v48  ;;  %2019 = vmatprep.mubr.msk.f32.mxu0 %vm2362_vm1, %v2361_v16  ;;  %v603_v56 = vmul.f32 %v2147_v45, %v601_v52  ;;  %v2102_v45 = vpack.c.bf16 %v1745_v44, %v1744_v23 }
 0x380   :  { %v789_v55 = vmul.f32 %v2139_v12, %v787_v53  ;;  %v602_v57 = vsub.f32 2.0, %v600_v54  ;;  %2027 = vmatprep.subr.mxu0 %v2361_v16 }
 0x381   :  { %v605_v59 = vmul.f32 %v2137_v11, %v603_v56 }
 0x382   :  { %2015 = vmatmul.mubr.msk.f32.vlgmr.msra.gmra.mrb[10].mxu1 %vm578_vm12, %v789_v55  ;;  %v604_v60 = vmul.f32 %v2149_v51, %v602_v57  ;;  %v1746_v57 = vld [vmem:[%s2748_s9 + $0x10] sm:$0xff] }
 0x383   :  { %2023 = vmatpush3.msra.mxu1 %v425_v58  ;;  %2024 = vmatprep.mubr.msk.f32.mxu1 %vm2362_vm1, %v2361_v16  ;;  %v1747_v58 = vld [vmem:[%s2748_s9 + $0x18] sm:$0xff]  ;;  %s2320_s9 = scalar_lea.vmem %s1844_s17, 256 }
 0x384   :  { %2032 = vmatprep.subr.mxu1 %v2361_v16  ;;  %v606_v61 = vmul.f32 %v2141_v15, %v604_v60  ;;  %p2321_p0 = scmp.ne.s32.totalorder %s1844_s17, %s2320_s9  ;;  %p2326_p2 = scmp.lt.s32.totalorder %s2320_s9, %s2320_s9 }
 0x386   :  { %2020 = vmatmul.mubr.msk.f32.vlgmr.msra.gmra.mrb[4].mxu0 %vm578_vm12, %v605_v59  ;;  %v2106_v59 = vpack.c.bf16 %v1747_v58, %v1746_v57  ;;  %p2327_p3 = por %p2326_p2, %p2325_p1 }
 0x387   :  { %2028 = vmatpush3.xpose.msk.msra.mxu0 %vm149_vm0, %v2569_v28  ;;  %2029 = vmatprep.mubr.msk.f32.mxu0 %vm2362_vm1, %v2361_v16 }
 0x388   :  { %2037 = vmatprep.subr.mxu0 %v2361_v16  ;;  %p2328_p4 = pnand %p2327_p3, %p2321_p0 }
 0x38a   :  { %2025 = vmatmul.mubr.msk.f32.vlgmr.msra.gmra.mrb[10].mxu1 %vm578_vm12, %v606_v61  ;;  %2030 = vmatmul.mubr.msk.f32.vlgmr.msra.gmra.mrb[6].mxu0 %vm149_vm0, %v2581_v34 }
 0x38b   :  { %2033 = vmatpush3.xpose.msk.msra.mxu1 %vm149_vm0, %v2587_v36  ;;  %2038 = vmatpush3.msra.mxu0 %v1089_v29 }
 0x38c   :  { %2034 = vmatprep.mubr.msk.f32.mxu1 %vm2362_vm1, %v2361_v16  ;;  %2042 = vmatprep.subr.mxu1 %v2361_v16 }
 0x38d   :  { %2039 = vmatprep.mubr.msk.f32.mxu0 %vm2362_vm1, %v2361_v16  ;;  %2047 = vmatprep.subr.mxu0 %v2361_v16 }
 0x38e   :  { %2035 = vmatmul.mubr.msk.f32.vlgmr.msra.gmra.mrb[12].mxu1 %vm149_vm0, %v2572_v31 }
 0x38f   :  { %2043 = vmatpush3.msra.mxu1 %v1090_v30  ;;  %2044 = vmatprep.mubr.msk.f32.mxu1 %vm2362_vm1, %v2361_v16 }
 0x390   :  { %2052 = vmatprep.subr.mxu1 %v2361_v16 }
 0x45d   :  { %v1160_v27 = vpop.f32.mrb[6].mxu0 }
 0x45e   :  { %v2031_v34 = vpop.f32.mrb[7].mxu0  ;;  %v1237_v62 = vsel %vm578_vm12, %v1160_v27, -inf }
 0x45f   :  { %1238 = vmax.xlane.f32.xlu0 %v1237_v62  ;;  %v1895_v62 = vld [vmem:[%s2749_s10] ss:$0 sm:$0xff] }
 0x461   :  { %v1233_v63 = vpop.f32.mrb[12].mxu1 }
 0x462   :  { %v2036_v0 = vpop.f32.mrb[13].mxu1  ;;  %v1240_v1 = vsel %vm578_vm12, %v1233_v63, -inf }
 0x463   :  { %1241 = vmax.xlane.f32.xlu1 %v1240_v1 }
 0x4ec   :  { %v1239_v2 = vpop.xlane.xlu0 %1238 }
 0x4ed   :  { %v1243_v3 = vsub.f32 %v1160_v27, %v1239_v2 }
 0x4ef   :  { %v1245_v4 = vmul.f32 1.442695, %v1243_v3 }
 0x4f0   :  { %v1242_v31 = vpop.xlane.xlu1 %1241 }
 0x4f1   :  { %2150 = vpow2.f32 %v1245_v4  ;;  %v1244_v5 = vsub.f32 %v1233_v63, %v1242_v31 }
 0x4f3   :  { %v1247_v6 = vmul.f32 1.442695, %v1244_v5 }
 0x4f5   :  { %2152 = vpow2.f32 %v1247_v6 }
 0x4fb   :  { %v2151_v7 = vpop.eup %2150 }
 0x4fc   :  { %v1249_v8 = vsel %vm578_vm12, %v2151_v7, 0.0 }
 0x4fd   :  { %1250 = vadd.xlane.f32.xlu0 %v1249_v8 }
 0x4ff   :  { %v2153_v9 = vpop.eup %2152 }
 0x500   :  { %v1252_v10 = vsel %vm578_vm12, %v2153_v9, 0.0 }
 0x501   :  { %1253 = vadd.xlane.f32.xlu1 %v1252_v10 }
 0x58a   :  { %v1251_v11 = vpop.xlane.xlu0 %1250 }
 0x58b   :  { %2154 = vrcp.f32 %v1251_v11 }
 0x58e   :  { %v1254_v12 = vpop.xlane.xlu1 %1253 }
 0x58f   :  { %2156 = vrcp.f32 %v1254_v12 }
 0x595   :  { %v2155_v13 = vpop.eup %2154 }
 0x596   :  { %v1257_v14 = vmul.f32 %v2155_v13, %v1251_v11 }
 0x598   :  { %v1259_v15 = vsub.f32 2.0, %v1257_v14 }
 0x599   :  { %v2157_v17 = vpop.eup %2156 }
 0x59a   :  { %v1261_v18 = vmul.f32 %v2155_v13, %v1259_v15  ;;  %v1258_v19 = vmul.f32 %v2157_v17, %v1254_v12 }
 0x59c   :  { %v1263_v20 = vmul.f32 %v2151_v7, %v1261_v18  ;;  %v1260_v21 = vsub.f32 2.0, %v1258_v19 }
 0x59e   :  { %v1262_v22 = vmul.f32 %v2157_v17, %v1260_v21  ;;  %2040 = vmatmul.mubr.msk.f32.vlgmr.msra.gmra.mrb[4].mxu0 %vm578_vm12, %v1263_v20 }
 0x59f   :  { %2048 = vmatpush3.xpose.msk.msra.mxu0 %vm149_vm0, %v2569_v28  ;;  %2049 = vmatprep.mubr.msk.f32.mxu0 %vm2362_vm1, %v2361_v16 }
 0x5a0   :  { %v1264_v25 = vmul.f32 %v2153_v9, %v1262_v22  ;;  %2057 = vmatprep.subr.mxu0 %v2361_v16 }
 0x5a2   :  { %2045 = vmatmul.mubr.msk.f32.vlgmr.msra.gmra.mrb[10].mxu1 %vm578_vm12, %v1264_v25  ;;  %2050 = vmatmul.mubr.msk.f32.vlgmr.msra.gmra.mrb[8].mxu0 %vm149_vm0, %v2584_v35 }
 0x5a3   :  { %2053 = vmatpush3.xpose.msk.msra.mxu1 %vm149_vm0, %v2587_v36  ;;  %2058 = vmatpush3.msra.mxu0 %v2635_v33 }
 0x5a4   :  { %2054 = vmatprep.mubr.msk.f32.mxu1 %vm2362_vm1, %v2361_v16  ;;  %2062 = vmatprep.subr.mxu1 %v2361_v16 }
 0x5a5   :  { %2059 = vmatprep.mubr.msk.f32.mxu0 %vm2362_vm1, %v2361_v16  ;;  %2103 = vmatprep.subr.bf16.mxu0 %v2102_v45 }
 0x5a6   :  { %2055 = vmatmul.mubr.msk.f32.vlgmr.msra.gmra.mrb[14].mxu1 %vm149_vm0, %v2575_v32 }
 0x5a7   :  { %2063 = vmatpush3.msra.mxu1 %v2638_v37  ;;  %2064 = vmatprep.mubr.msk.f32.mxu1 %vm2362_vm1, %v2361_v16 }
 0x675   :  { %v1491_v28 = vpop.f32.mrb[8].mxu0 }
 0x676   :  { %v2051_v35 = vpop.f32.mrb[9].mxu0  ;;  %v1568_v36 = vsel %vm578_vm12, %v1491_v28, -inf }
 0x677   :  { %1569 = vmax.xlane.f32.xlu0 %v1568_v36 }
 0x679   :  { %v1564_v26 = vpop.f32.mrb[14].mxu1 }
 0x67a   :  { %v2056_v29 = vpop.f32.mrb[15].mxu1  ;;  %v1571_v30 = vsel %vm578_vm12, %v1564_v26, -inf }
 0x67b   :  { %1572 = vmax.xlane.f32.xlu1 %v1571_v30 }
 0x704   :  { %v1570_v33 = vpop.xlane.xlu0 %1569 }
 0x705   :  { %v1574_v39 = vsub.f32 %v1491_v28, %v1570_v33 }
 0x707   :  { %v1576_v40 = vmul.f32 1.442695, %v1574_v39 }
 0x708   :  { %v1573_v41 = vpop.xlane.xlu1 %1572 }
 0x709   :  { %2158 = vpow2.f32 %v1576_v40  ;;  %v1575_v32 = vsub.f32 %v1564_v26, %v1573_v41 }
 0x70b   :  { %v1578_v37 = vmul.f32 1.442695, %v1575_v32 }
 0x70d   :  { %2160 = vpow2.f32 %v1578_v37 }
 0x713   :  { %v2159_v38 = vpop.eup %2158 }
 0x714   :  { %v1580_v16 = vsel %vm578_vm12, %v2159_v38, 0.0 }
 0x715   :  { %1581 = vadd.xlane.f32.xlu0 %v1580_v16 }
 0x717   :  { %v2161_v42 = vpop.eup %2160 }
 0x718   :  { %v1583_v43 = vsel %vm578_vm12, %v2161_v42, 0.0 }
 0x719   :  { %1584 = vadd.xlane.f32.xlu1 %v1583_v43 }
 0x7a2   :  { %v1582_v46 = vpop.xlane.xlu0 %1581 }
 0x7a3   :  { %2162 = vrcp.f32 %v1582_v46 }
 0x7a6   :  { %v1585_v47 = vpop.xlane.xlu1 %1584 }
 0x7a7   :  { %2164 = vrcp.f32 %v1585_v47 }
 0x7ad   :  { %v2163_v24 = vpop.eup %2162 }
 0x7ae   :  { %v1588_v48 = vmul.f32 %v2163_v24, %v1582_v46 }
 0x7b0   :  { %v1590_v49 = vsub.f32 2.0, %v1588_v48 }
 0x7b1   :  { %v2165_v50 = vpop.eup %2164 }
 0x7b2   :  { %v1592_v51 = vmul.f32 %v2163_v24, %v1590_v49  ;;  %v1589_v52 = vmul.f32 %v2165_v50, %v1585_v47 }
 0x7b4   :  { %v1594_v53 = vmul.f32 %v2159_v38, %v1592_v51  ;;  %v1591_v54 = vsub.f32 2.0, %v1589_v52 }
 0x7b6   :  { %v1593_v55 = vmul.f32 %v2165_v50, %v1591_v54  ;;  %2060 = vmatmul.mubr.msk.f32.vlgmr.msra.gmra.mrb[4].mxu0 %vm578_vm12, %v1594_v53 }
 0x7b7   :  { %2105 = vmatpush3.bf16.msra.mxu0 %v2102_v45 }
 0x7b8   :  { %v1595_v56 = vmul.f32 %v2161_v42, %v1593_v55  ;;  %2107 = vmatprep.subr.bf16.mxu0 %v2106_v59 }
 0x7ba   :  { %2065 = vmatmul.mubr.msk.f32.vlgmr.msra.gmra.mrb[10].mxu1 %vm578_vm12, %v1595_v56 }
 0x7bb   :  { %2109 = vmatpush3.bf16.msra.mxu0 %v2106_v59 }
 0x889   :  { %v1665_v60 = vpop.f32.mrb[4].mxu0 }
 0x88a   :  { %v2061_v61 = vpop.f32.mrb[5].mxu0  ;;  %2075 = vmatprep.mubr.msk.f32.mxu0 %vm149_vm0, %v1665_v60 }
 0x88d   :  { %v1738_v27 = vpop.f32.mrb[10].mxu1 }
 0x88e   :  { %v2066_v34 = vpop.f32.mrb[11].mxu1  ;;  %2076 = vmatmul.mubr.msk.f32.vlgmr.msra.gmra.mrb[10].mxu0 %vm149_vm0, %v1738_v27 }
 0x961   :  { %v2077_v63 = vpop.f32.mrb[10].mxu0 }
 0x962   :  { %v1833_v0 = vadd.f32 %v2077_v63, %v1895_v62  ;;  %v1827_v1 = vpop.f32.mrb[11].mxu0 }
 0x963   :  { %v1828_v2 = vadd.f32 %v1895_v62, %v1827_v1 }
 0x964   :  { %1837 = vst.msk [vmem:[#allocation14 + $0x8] sm:$0xff] %vm149_vm0, %v1833_v0 }
 0x965   :  { %1836 = vst.msk [vmem:[#allocation14] sm:$0xff] %vm149_vm0, %v1828_v2 }
 0x966   :  { %2331 = shalt.err (!%p2328_p4)
}
 0x967   :  { %s2332_s20 = scalar_lea.hbm %s2750_s11, 256 }
 0x968   :  { %p2333_p5 = scmp.ne.s32.totalorder %s2750_s11, %s2332_s20  ;;  %p2336_p6 = scmp.lt.u32.totalorder %s2332_s20, %s2750_s11 }
 0x96a   :  { %p2338_p7 = pnand %p2336_p6, %p2333_p5 }
 0x96c   :  { %2341 = shalt.err (!%p2338_p7)
}
 0x96d   :  { %1849 = dma.vmem_to_hbm [thread:$0]  %s1844_s17, 256, %s2750_s11, [#allocation4], %s2354_s29, %s2354_s29, %s2355_s30  }
 0x96e   :  { %2350 = dma.done.wait [#allocation4], 256  }
 0x96f   :  { %2351 = vsyncadd [#allocation4], 4294967040 }
 0x970   :  { %1853 = vsyncpa [#allocation3], 1 }
 0x971   :  { %1854 = vsyncpa [#allocation6], 1 }
 0x972   :  { %1855 = vsyncpa [#allocation9], 1 }
 0x973   :  { %1856 = vsyncpa [#allocation12], 1 }
 0x974   :  { %1857 = vsyncpa [#allocation4], 1 }

</bundles_post_ra>
